<compile_context>
chip_gen: v5e
topology: v5e:2x2
jax: 0.10.0
libtpu: 0.0.40
codegen_flags: <defaults>
</compile_context>

<pallas_src>
import functools

import jax
import jax.numpy as jnp
from jax import lax
from jax.experimental import pallas as pl
from jax.experimental.pallas import tpu as pltpu

GM_FEATS = 10   # reference hard-codes gm[b*10:(b+1)*10] -> last 10 feature columns
GM_WIDTH = 16   # lane width of the per-row gm stream fed to the kernel


def _round_up(a, m):
    return -(-a // m) * m


# ----------------------------------------------------------------------------
# Fused kernel: one grid step = one block of rows through the whole network.
# ----------------------------------------------------------------------------
def _fused_lstm_kernel(gn_ref, gmw_ref, *rest, h_from_enc, c_from_enc, has_state):
    if has_state:
        state_ref, *rest = rest
    else:
        state_ref = None
    (enc_w_ref, enc_b_ref, wih_ref, whh_ref, b_ref,
     dec_w1_ref, dec_b1_ref, dec_w2_ref, dec_b2_ref, out_ref) = rest

    num_layers = len(h_from_enc)
    n, D = gn_ref.shape
    H = enc_b_ref.shape[1]
    GW = gmw_ref.shape[1]
    O = dec_w2_ref.shape[1]

    gn = gn_ref[...]            # f32 [n, D]
    gm16 = gmw_ref[...]         # f32 [n, GW]; gm payload in LAST GM_FEATS lanes

    def gm_tail(width):
        # [n, width] with the gm payload in the last GM_FEATS lanes.
        if width == GW:
            return gm16
        if width > GW:
            return jnp.concatenate(
                [jnp.zeros((n, width - GW), jnp.float32), gm16], axis=1)
        return gm16[:, GW - width:]

    enc_w = enc_w_ref[...]      # [D, H]
    enc_b = enc_b_ref[...]      # [1, H]

    def encode(x):
        acc = jnp.dot(x, enc_w, preferred_element_type=jnp.float32)
        return jnp.maximum(acc + enc_b, 0.0)

    # Shared encoder init for any None H/C — computed exactly once.
    if any(h_from_enc) or any(c_from_enc):
        enc_init = encode(gn)

    # Layer-0 input: graph_node with last GM_FEATS cols replaced by gm, encoded.
    col_d = lax.broadcasted_iota(jnp.int32, (n, D), 1)
    x_in = encode(jnp.where(col_d >= D - GM_FEATS, gm_tail(D), gn))   # [n, H]

    col_h = lax.broadcasted_iota(jnp.int32, (n, H), 1)
    gm_h = gm_tail(H)           # [n, H], gm in last GM_FEATS lanes (hoisted)

    h_prev_layer = None
    h_last = c_last = None
    for l in range(num_layers):
        if h_from_enc[l]:
            h_prev = enc_init
        else:
            h_prev = state_ref[:, (2 * l) * H:(2 * l + 1) * H]
        if c_from_enc[l]:
            c_prev = enc_init
        else:
            c_prev = state_ref[:, (2 * l + 1) * H:(2 * l + 2) * H]

        if l > 0:
            # next_cell_input: previous layer's fresh H with gm in its last cols.
            x_in = jnp.where(col_h >= H - GM_FEATS, gm_h, h_prev_layer)

        # Two small dots summed into one f32 accumulator (no lane concat).
        gates = (jnp.dot(x_in, wih_ref[l], preferred_element_type=jnp.float32)
                 + jnp.dot(h_prev, whh_ref[l], preferred_element_type=jnp.float32)
                 + b_ref[l])                                          # [n, 4H]

        sig = jax.nn.sigmoid(gates)            # covers i / f / o gates
        i_g = sig[:, 0 * H:1 * H]
        f_g = sig[:, 1 * H:2 * H]
        o_g = sig[:, 3 * H:4 * H]
        g_g = jnp.tanh(gates[:, 2 * H:3 * H])  # tanh only on the g slice
        c_new = f_g * c_prev + i_g * g_g
        h_new = o_g * jnp.tanh(c_new)

        # Slice-store straight into the lane-dense output slab.
        out_ref[:, (2 * l) * H:(2 * l + 1) * H] = h_new
        out_ref[:, (2 * l + 1) * H:(2 * l + 2) * H] = c_new
        h_prev_layer = h_new
        h_last, c_last = h_new, c_new

    # response_decoder(cat([H_last, C_last])): split W1 into H/C halves instead
    # of concatenating the state along lanes.
    dw1 = dec_w1_ref[...]                        # [2H, 64]
    hid = jnp.maximum(
        jnp.dot(h_last, dw1[:H, :], preferred_element_type=jnp.float32)
        + jnp.dot(c_last, dw1[H:, :], preferred_element_type=jnp.float32)
        + dec_b1_ref[...], 0.0)
    y = jnp.maximum(
        jnp.dot(hid, dec_w2_ref[...], preferred_element_type=jnp.float32)
        + dec_b2_ref[...], 0.0)
    out_ref[:, 2 * num_layers * H:2 * num_layers * H + O] = y


def _fused_forward(gn, gm16, state, params, *, h_from_enc, c_from_enc, block_rows):
    has_state = state is not None
    n_pad, D = gn.shape
    GW = gm16.shape[1]
    L, H, four_h = params["w_ih"].shape
    dec_hid = params["dec_w1"].shape[1]
    O = params["dec_w2"].shape[1]
    slab_w = 2 * L * H + O
    grid = (n_pad // block_rows,)

    in_specs = [
        pl.BlockSpec((block_rows, D), lambda i: (i, 0)),     # graph_node
        pl.BlockSpec((block_rows, GW), lambda i: (i, 0)),    # gm stream
    ]
    operands = [gn, gm16]
    if has_state:
        in_specs.append(pl.BlockSpec((block_rows, 2 * L * H), lambda i: (i, 0)))
        operands.append(state)                               # lane-dense state slab
    in_specs += [
        pl.BlockSpec((D, H), lambda i: (0, 0)),              # enc_w
        pl.BlockSpec((1, H), lambda i: (0, 0)),              # enc_b
        pl.BlockSpec((L, H, four_h), lambda i: (0, 0, 0)),   # w_ih stack
        pl.BlockSpec((L, H, four_h), lambda i: (0, 0, 0)),   # w_hh stack
        pl.BlockSpec((L, 1, four_h), lambda i: (0, 0, 0)),   # b_ih + b_hh
        pl.BlockSpec((2 * H, dec_hid), lambda i: (0, 0)),    # dec_w1
        pl.BlockSpec((1, dec_hid), lambda i: (0, 0)),        # dec_b1
        pl.BlockSpec((dec_hid, O), lambda i: (0, 0)),        # dec_w2
        pl.BlockSpec((1, O), lambda i: (0, 0)),              # dec_b2
    ]
    operands += [params["enc_w"], params["enc_b"],
                 params["w_ih"], params["w_hh"], params["b"],
                 params["dec_w1"], params["dec_b1"],
                 params["dec_w2"], params["dec_b2"]]

    kernel = functools.partial(_fused_lstm_kernel,
                               h_from_enc=h_from_enc, c_from_enc=c_from_enc,
                               has_state=has_state)
    return pl.pallas_call(
        kernel,
        out_shape=jax.ShapeDtypeStruct((n_pad, slab_w), jnp.float32),
        grid=grid,
        in_specs=in_specs,
        out_specs=pl.BlockSpec((block_rows, slab_w), lambda i: (i, 0)),
        compiler_params=pltpu.CompilerParams(
            dimension_semantics=("parallel",),          # shards rows on v7x 2 TCs
            vmem_limit_bytes=48 * 1024 * 1024),          # portable v5e/v6e/v7x
    )(*operands)


# ----------------------------------------------------------------------------
# JIT wrapper: per-row gm gather, row padding, slab split.
# ----------------------------------------------------------------------------
@functools.partial(jax.jit,
                   static_argnames=("block_rows", "h_from_enc", "c_from_enc"))
def _lstm_forward_impl(params, gm, graph_node, ptr_arr, state, *,
                       block_rows, h_from_enc, c_from_enc):
    L, H, _ = params["w_ih"].shape
    O = params["dec_w2"].shape[1]
    n = graph_node.shape[0]
    n_graphs = ptr_arr.shape[0] - 1

    # Per-row gm gather: [n, GM_WIDTH] f32, payload in the LAST GM_FEATS lanes.
    row = jnp.arange(n, dtype=jnp.int32)
    gid = jnp.clip(jnp.searchsorted(ptr_arr, row, side="right") - 1, 0, n_graphs - 1)
    gm_rows = gm.astype(jnp.float32).reshape(n_graphs, GM_FEATS)[gid]
    gm16 = jnp.pad(gm_rows, ((0, 0), (GM_WIDTH - GM_FEATS, 0)))

    # Row block: multiple of 16; big (default 1024) since the kernel is HBM-bound.
    n16 = _round_up(n, 16)
    blk = min(block_rows, n16)
    if n16 >= 512:                       # keep >=2 grid steps -> both v7x cores busy
        blk = min(blk, _round_up(-(-n16 // 2), 16))
    blk = _round_up(blk, 16)
    n_pad = _round_up(n, blk)
    pad = n_pad - n

    gn_p = jnp.pad(graph_node.astype(jnp.float32), ((0, pad), (0, 0)))
    gm_p = jnp.pad(gm16, ((0, pad), (0, 0)))
    state_p = None if state is None else jnp.pad(state, ((0, pad), (0, 0)))

    slab = _fused_forward(gn_p, gm_p, state_p, params,
                          h_from_enc=h_from_enc, c_from_enc=c_from_enc,
                          block_rows=blk)
    slab = slab[:n]
    H_out = [slab[:, (2 * l) * H:(2 * l + 1) * H] for l in range(L)]
    C_out = [slab[:, (2 * l + 1) * H:(2 * l + 2) * H] for l in range(L)]
    y = slab[:, 2 * L * H:2 * L * H + O]
    return H_out, C_out, y


def lstm_forward(params, gm, graph_node, ptr, H_list, C_list, *, block_rows=1024):
    """Matches LSTM.forward(gm, graph_node, edge_index, edge_attr, ptr, H_list, C_list)."""
    L, H, _ = params["w_ih"].shape
    D = params["enc_w"].shape[0]
    assert GM_FEATS <= D and GM_FEATS <= H, "gm scatter needs >=10 feature/hidden cols"
    n = graph_node.shape[0]
    h_from_enc = tuple(h is None for h in H_list)
    c_from_enc = tuple(c is None for c in C_list)
    if all(h_from_enc) and all(c_from_enc):
        state = None                      # first step: no dead state DMA at all
    else:
        zeros = jnp.zeros((n, H), jnp.float32)
        pieces = []
        for l in range(L):
            pieces.append(zeros if H_list[l] is None else jnp.asarray(H_list[l], jnp.float32))
            pieces.append(zeros if C_list[l] is None else jnp.asarray(C_list[l], jnp.float32))
        state = jnp.concatenate(pieces, axis=1)     # lane-dense [n, 2*L*H] slab
    ptr_arr = jnp.asarray(ptr, dtype=jnp.int32)
    return _lstm_forward_impl(params, gm, graph_node, ptr_arr, state,
                              block_rows=block_rows,
                              h_from_enc=h_from_enc, c_from_enc=c_from_enc)


# ----------------------------------------------------------------------------
# Parameters (torch-style uniform init; matmul weights stored transposed, f32).
# ----------------------------------------------------------------------------
def init_params(key, input_dim, hidden_dim, output_dim, num_layers):
    def uniform(k, shape, fan):
        bound = 1.0 / jnp.sqrt(jnp.asarray(fan, jnp.float32))
        return jax.random.uniform(k, shape, jnp.float32, -bound, bound)

    keys = iter(jax.random.split(key, 6 + 4 * num_layers))
    enc_w = uniform(next(keys), (input_dim, hidden_dim), input_dim)
    enc_b = uniform(next(keys), (1, hidden_dim), input_dim)
    dec_w1 = uniform(next(keys), (2 * hidden_dim, 64), 2 * hidden_dim)
    dec_b1 = uniform(next(keys), (1, 64), 2 * hidden_dim)
    dec_w2 = uniform(next(keys), (64, output_dim), 64)
    dec_b2 = uniform(next(keys), (1, output_dim), 64)

    w_ih, w_hh, b = [], [], []
    for _ in range(num_layers):
        w_ih.append(uniform(next(keys), (hidden_dim, 4 * hidden_dim), hidden_dim))
        w_hh.append(uniform(next(keys), (hidden_dim, 4 * hidden_dim), hidden_dim))
        b_ih = uniform(next(keys), (1, 4 * hidden_dim), hidden_dim)
        b_hh = uniform(next(keys), (1, 4 * hidden_dim), hidden_dim)
        b.append(b_ih + b_hh)

    return {
        "enc_w": enc_w, "enc_b": enc_b,
        "dec_w1": dec_w1, "dec_b1": dec_b1,
        "dec_w2": dec_w2, "dec_b2": dec_b2,
        "w_ih": jnp.stack(w_ih),          # [L, H, 4H]
        "w_hh": jnp.stack(w_hh),          # [L, H, 4H]
        "b": jnp.stack(b),                # [L, 1, 4H]
    }


# ----------------------------------------------------------------------------
# Pure-JAX reference (f32) for a numerical check.
# ----------------------------------------------------------------------------
def _reference_forward(params, gm, graph_node, ptr, H_list, C_list):
    relu = lambda v: jnp.maximum(v, 0.0)
    encode = lambda x: relu(x @ params["enc_w"] + params["enc_b"])
    L, H, _ = params["w_ih"].shape
    bs = len(ptr) - 1

    def scatter(mat):
        out = mat
        for b in range(bs):
            seg = gm[b * GM_FEATS:(b + 1) * GM_FEATS]
            rows = ptr[b + 1] - ptr[b]
            out = out.at[ptr[b]:ptr[b + 1], -GM_FEATS:].set(
                jnp.broadcast_to(seg, (rows, GM_FEATS)))
        return out

    X = encode(scatter(graph_node))
    Hs = [encode(graph_node) if h is None else jnp.asarray(h, jnp.float32) for h in H_list]
    Cs = [encode(graph_node) if c is None else jnp.asarray(c, jnp.float32) for c in C_list]
    for l in range(L):
        x_in = X if l == 0 else scatter(Hs[l - 1])
        gates = x_in @ params["w_ih"][l] + Hs[l] @ params["w_hh"][l] + params["b"][l]
        i = jax.nn.sigmoid(gates[:, 0:H]); f = jax.nn.sigmoid(gates[:, H:2 * H])
        g = jnp.tanh(gates[:, 2 * H:3 * H]); o = jax.nn.sigmoid(gates[:, 3 * H:4 * H])
        c_new = f * Cs[l] + i * g
        h_new = o * jnp.tanh(c_new)
        Hs[l], Cs[l] = h_new, c_new
    state = jnp.concatenate([Hs[-1], Cs[-1]], axis=1)
    hid = relu(state @ params["dec_w1"] + params["dec_b1"])
    y = relu(hid @ params["dec_w2"] + params["dec_b2"])
    return Hs, Cs, y


# ----------------------------------------------------------------------------
if __name__ == "__main__":
    input_dim, hidden_dim, output_dim, num_layers = 16, 32, 8, 2

    key = jax.random.PRNGKey(0)
    k_param, k_graph, k_gm = jax.random.split(key, 3)
    params = init_params(k_param, input_dim, hidden_dim, output_dim, num_layers)

    # batch of 2 graphs with 5 and 7 nodes
    ptr = [0, 5, 12]
    n_total = ptr[-1]
    bs = len(ptr) - 1
    graph_node = jax.random.normal(k_graph, (n_total, input_dim), jnp.float32)
    gm = jax.random.normal(k_gm, (GM_FEATS * bs,), jnp.float32)

    H_list = [None] * num_layers
    C_list = [None] * num_layers

    # Step 1: H/C initialized from the encoder inside the kernel (no state DMA).
    H_out, C_out, y = lstm_forward(params, gm, graph_node, ptr, H_list, C_list)
    jax.block_until_ready(y)
    jax.block_until_ready(H_out[-1])
    jax.block_until_ready(C_out[-1])

    assert y.shape == (n_total, output_dim)
    assert all(h.shape == (n_total, hidden_dim) for h in H_out)
    assert all(c.shape == (n_total, hidden_dim) for c in C_out)

    H_ref, C_ref, y_ref = _reference_forward(params, gm, graph_node, ptr, H_list, C_list)
    assert float(jnp.max(jnp.abs(y - y_ref))) < 5e-3
    for l in range(num_layers):
        assert float(jnp.max(jnp.abs(H_out[l] - H_ref[l]))) < 5e-3
        assert float(jnp.max(jnp.abs(C_out[l] - C_ref[l]))) < 5e-3

    # Step 2: feed the states back in (lane-dense state-slab input path).
    H_out2, C_out2, y2 = lstm_forward(params, gm, graph_node, ptr, H_out, C_out)
    jax.block_until_ready(y2)
    H_ref2, C_ref2, y_ref2 = _reference_forward(params, gm, graph_node, ptr, H_ref, C_ref)
    assert y2.shape == (n_total, output_dim)
    assert float(jnp.max(jnp.abs(y2 - y_ref2))) < 5e-3

    print("KERNEL_OK")
</pallas_src>

<mosaic_0001>
module attributes {stable_mosaic.version = 11 : i64} {
  func.func @_fused_lstm_kernel(%arg0: i32, %arg1: memref<16x16xf32, #tpu.memory_space<vmem>>, %arg2: memref<16x16xf32, #tpu.memory_space<vmem>>, %arg3: memref<16x32xf32, #tpu.memory_space<vmem>>, %arg4: memref<1x32xf32, #tpu.memory_space<vmem>>, %arg5: memref<2x32x128xf32, #tpu.memory_space<vmem>>, %arg6: memref<2x32x128xf32, #tpu.memory_space<vmem>>, %arg7: memref<2x1x128xf32, #tpu.memory_space<vmem>>, %arg8: memref<64x64xf32, #tpu.memory_space<vmem>>, %arg9: memref<1x64xf32, #tpu.memory_space<vmem>>, %arg10: memref<64x8xf32, #tpu.memory_space<vmem>>, %arg11: memref<1x8xf32, #tpu.memory_space<vmem>>, %arg12: memref<16x136xf32, #tpu.memory_space<vmem>>) attributes {dimension_semantics = [#tpu.dimension_semantics<parallel>], iteration_bounds = array<i64: 1>, scalar_prefetch = 0 : i64, scratch_operands = 0 : i64, tpu.core_type = #tpu.core_type<tc>, window_params = [{transform_indices = @transform_0, window_bounds = array<i64: 16, 16>}, {transform_indices = @transform_1, window_bounds = array<i64: 16, 16>}, {pipeline_mode = #tpu.pipeline_mode<synchronous>, transform_indices = @transform_2, window_bounds = array<i64: 16, 32>}, {pipeline_mode = #tpu.pipeline_mode<synchronous>, transform_indices = @transform_3, window_bounds = array<i64: 1, 32>}, {pipeline_mode = #tpu.pipeline_mode<synchronous>, transform_indices = @transform_4, window_bounds = array<i64: 2, 32, 128>}, {pipeline_mode = #tpu.pipeline_mode<synchronous>, transform_indices = @transform_5, window_bounds = array<i64: 2, 32, 128>}, {pipeline_mode = #tpu.pipeline_mode<synchronous>, transform_indices = @transform_6, window_bounds = array<i64: 2, 1, 128>}, {pipeline_mode = #tpu.pipeline_mode<synchronous>, transform_indices = @transform_7, window_bounds = array<i64: 64, 64>}, {pipeline_mode = #tpu.pipeline_mode<synchronous>, transform_indices = @transform_8, window_bounds = array<i64: 1, 64>}, {pipeline_mode = #tpu.pipeline_mode<synchronous>, transform_indices = @transform_9, window_bounds = array<i64: 64, 8>}, {pipeline_mode = #tpu.pipeline_mode<synchronous>, transform_indices = @transform_10, window_bounds = array<i64: 1, 8>}, {transform_indices = @transform_11, window_bounds = array<i64: 16, 136>}]} {
    %c0 = arith.constant 0 : index
    %c0_0 = arith.constant 0 : index
    %0 = vector.load %arg1[%c0, %c0_0] : memref<16x16xf32, #tpu.memory_space<vmem>>, vector<16x16xf32>
    %c0_1 = arith.constant 0 : index
    %c0_2 = arith.constant 0 : index
    %1 = vector.load %arg2[%c0_1, %c0_2] : memref<16x16xf32, #tpu.memory_space<vmem>>, vector<16x16xf32>
    %c0_3 = arith.constant 0 : index
    %c0_4 = arith.constant 0 : index
    %2 = vector.load %arg3[%c0_3, %c0_4] : memref<16x32xf32, #tpu.memory_space<vmem>>, vector<16x32xf32>
    %c0_5 = arith.constant 0 : index
    %c0_6 = arith.constant 0 : index
    %3 = vector.load %arg4[%c0_5, %c0_6] : memref<1x32xf32, #tpu.memory_space<vmem>>, vector<1x32xf32>
    %cst = arith.constant dense<0.000000e+00> : vector<16x32xf32>
    %4 = tpu.matmul %0, %2, %cst {dimension_numbers = #tpu.dot_dimension_numbers<[1], [0], [0], [1], [0, 0, 1, 1], [], []>} : vector<16x16xf32>, vector<16x32xf32>, vector<16x32xf32> -> vector<16x32xf32>
    %5 = vector.broadcast %3 : vector<1x32xf32> to vector<16x32xf32>
    %6 = arith.addf %4, %5 : vector<16x32xf32>
    %cst_7 = arith.constant 0.000000e+00 : f32
    %7 = vector.broadcast %cst_7 : f32 to vector<16x32xf32>
    %8 = arith.maximumf %6, %7 : vector<16x32xf32>
    %9 = tpu.iota {dimensions = array<i32: 1>} : vector<16x16xi32>
    %c6_i32 = arith.constant 6 : i32
    %10 = vector.broadcast %c6_i32 : i32 to vector<16x16xi32>
    %11 = arith.cmpi sge, %9, %10 : vector<16x16xi32>
    %12 = arith.select %11, %1, %0 : vector<16x16xi1>, vector<16x16xf32>
    %cst_8 = arith.constant dense<0.000000e+00> : vector<16x32xf32>
    %13 = tpu.matmul %12, %2, %cst_8 {dimension_numbers = #tpu.dot_dimension_numbers<[1], [0], [0], [1], [0, 0, 1, 1], [], []>} : vector<16x16xf32>, vector<16x32xf32>, vector<16x32xf32> -> vector<16x32xf32>
    %14 = vector.broadcast %3 : vector<1x32xf32> to vector<16x32xf32>
    %15 = arith.addf %13, %14 : vector<16x32xf32>
    %cst_9 = arith.constant 0.000000e+00 : f32
    %16 = vector.broadcast %cst_9 : f32 to vector<16x32xf32>
    %17 = arith.maximumf %15, %16 : vector<16x32xf32>
    %18 = tpu.iota {dimensions = array<i32: 1>} : vector<16x32xi32>
    %cst_10 = arith.constant 0.000000e+00 : f32
    %19 = vector.broadcast %cst_10 : f32 to vector<16x16xf32>
    %20 = tpu.concatenate %19, %1 in 1 : vector<16x16xf32>, vector<16x16xf32> -> vector<16x32xf32>
    %c0_11 = arith.constant 0 : index
    %c0_12 = arith.constant 0 : index
    %c0_13 = arith.constant 0 : index
    %21 = vector.load %arg5[%c0_11, %c0_12, %c0_13] : memref<2x32x128xf32, #tpu.memory_space<vmem>>, vector<1x32x128xf32>
    %22 = vector.shape_cast %21 : vector<1x32x128xf32> to vector<32x128xf32>
    %cst_14 = arith.constant dense<0.000000e+00> : vector<16x128xf32>
    %23 = tpu.matmul %17, %22, %cst_14 {dimension_numbers = #tpu.dot_dimension_numbers<[1], [0], [0], [1], [0, 0, 1, 1], [], []>} : vector<16x32xf32>, vector<32x128xf32>, vector<16x128xf32> -> vector<16x128xf32>
    %c0_15 = arith.constant 0 : index
    %c0_16 = arith.constant 0 : index
    %c0_17 = arith.constant 0 : index
    %24 = vector.load %arg6[%c0_15, %c0_16, %c0_17] : memref<2x32x128xf32, #tpu.memory_space<vmem>>, vector<1x32x128xf32>
    %25 = vector.shape_cast %24 : vector<1x32x128xf32> to vector<32x128xf32>
    %cst_18 = arith.constant dense<0.000000e+00> : vector<16x128xf32>
    %26 = tpu.matmul %8, %25, %cst_18 {dimension_numbers = #tpu.dot_dimension_numbers<[1], [0], [0], [1], [0, 0, 1, 1], [], []>} : vector<16x32xf32>, vector<32x128xf32>, vector<16x128xf32> -> vector<16x128xf32>
    %27 = arith.addf %23, %26 : vector<16x128xf32>
    %c0_19 = arith.constant 0 : index
    %c0_20 = arith.constant 0 : index
    %c0_21 = arith.constant 0 : index
    %28 = vector.load %arg7[%c0_19, %c0_20, %c0_21] : memref<2x1x128xf32, #tpu.memory_space<vmem>>, vector<1x1x128xf32>
    %29 = vector.shape_cast %28 : vector<1x1x128xf32> to vector<1x128xf32>
    %30 = vector.broadcast %29 : vector<1x128xf32> to vector<16x128xf32>
    %31 = arith.addf %27, %30 : vector<16x128xf32>
    %32 = arith.negf %31 : vector<16x128xf32>
    %33 = math.exp %32 : vector<16x128xf32>
    %cst_22 = arith.constant 1.000000e+00 : f32
    %34 = vector.broadcast %cst_22 : f32 to vector<16x128xf32>
    %35 = arith.addf %34, %33 : vector<16x128xf32>
    %36 = arith.divf %34, %35 : vector<16x128xf32>
    %37 = vector.extract_strided_slice %36 {offsets = [0, 0], sizes = [16, 32], strides = [1, 1]} : vector<16x128xf32> to vector<16x32xf32>
    %38 = vector.extract_strided_slice %36 {offsets = [0, 32], sizes = [16, 32], strides = [1, 1]} : vector<16x128xf32> to vector<16x32xf32>
    %39 = vector.extract_strided_slice %36 {offsets = [0, 96], sizes = [16, 32], strides = [1, 1]} : vector<16x128xf32> to vector<16x32xf32>
    %40 = vector.extract_strided_slice %31 {offsets = [0, 64], sizes = [16, 32], strides = [1, 1]} : vector<16x128xf32> to vector<16x32xf32>
    %41 = math.tanh %40 : vector<16x32xf32>
    %42 = arith.mulf %38, %8 : vector<16x32xf32>
    %43 = arith.mulf %37, %41 : vector<16x32xf32>
    %44 = arith.addf %42, %43 : vector<16x32xf32>
    %45 = math.tanh %44 : vector<16x32xf32>
    %46 = arith.mulf %39, %45 : vector<16x32xf32>
    %c0_23 = arith.constant 0 : index
    %c0_24 = arith.constant 0 : index
    %47 = vector.load %arg12[%c0_23, %c0_24] : memref<16x136xf32, #tpu.memory_space<vmem>>, vector<16x32xf32>
    tpu.vector_store %arg12[%c0_23, %c0_24], %46 {strides = array<i32>} : memref<16x136xf32, #tpu.memory_space<vmem>>, vector<16x32xf32>,
    %c0_25 = arith.constant 0 : index
    %c32 = arith.constant 32 : index
    %48 = vector.load %arg12[%c0_25, %c32] : memref<16x136xf32, #tpu.memory_space<vmem>>, vector<16x32xf32>
    tpu.vector_store %arg12[%c0_25, %c32], %44 {strides = array<i32>} : memref<16x136xf32, #tpu.memory_space<vmem>>, vector<16x32xf32>,
    %c22_i32 = arith.constant 22 : i32
    %49 = vector.broadcast %c22_i32 : i32 to vector<16x32xi32>
    %50 = arith.cmpi sge, %18, %49 : vector<16x32xi32>
    %51 = arith.select %50, %20, %46 : vector<16x32xi1>, vector<16x32xf32>
    %c1 = arith.constant 1 : index
    %c0_26 = arith.constant 0 : index
    %c0_27 = arith.constant 0 : index
    %52 = vector.load %arg5[%c1, %c0_26, %c0_27] : memref<2x32x128xf32, #tpu.memory_space<vmem>>, vector<1x32x128xf32>
    %53 = vector.shape_cast %52 : vector<1x32x128xf32> to vector<32x128xf32>
    %cst_28 = arith.constant dense<0.000000e+00> : vector<16x128xf32>
    %54 = tpu.matmul %51, %53, %cst_28 {dimension_numbers = #tpu.dot_dimension_numbers<[1], [0], [0], [1], [0, 0, 1, 1], [], []>} : vector<16x32xf32>, vector<32x128xf32>, vector<16x128xf32> -> vector<16x128xf32>
    %c1_29 = arith.constant 1 : index
    %c0_30 = arith.constant 0 : index
    %c0_31 = arith.constant 0 : index
    %55 = vector.load %arg6[%c1_29, %c0_30, %c0_31] : memref<2x32x128xf32, #tpu.memory_space<vmem>>, vector<1x32x128xf32>
    %56 = vector.shape_cast %55 : vector<1x32x128xf32> to vector<32x128xf32>
    %cst_32 = arith.constant dense<0.000000e+00> : vector<16x128xf32>
    %57 = tpu.matmul %8, %56, %cst_32 {dimension_numbers = #tpu.dot_dimension_numbers<[1], [0], [0], [1], [0, 0, 1, 1], [], []>} : vector<16x32xf32>, vector<32x128xf32>, vector<16x128xf32> -> vector<16x128xf32>
    %58 = arith.addf %54, %57 : vector<16x128xf32>
    %c1_33 = arith.constant 1 : index
    %c0_34 = arith.constant 0 : index
    %c0_35 = arith.constant 0 : index
    %59 = vector.load %arg7[%c1_33, %c0_34, %c0_35] : memref<2x1x128xf32, #tpu.memory_space<vmem>>, vector<1x1x128xf32>
    %60 = vector.shape_cast %59 : vector<1x1x128xf32> to vector<1x128xf32>
    %61 = vector.broadcast %60 : vector<1x128xf32> to vector<16x128xf32>
    %62 = arith.addf %58, %61 : vector<16x128xf32>
    %63 = arith.negf %62 : vector<16x128xf32>
    %64 = math.exp %63 : vector<16x128xf32>
    %cst_36 = arith.constant 1.000000e+00 : f32
    %65 = vector.broadcast %cst_36 : f32 to vector<16x128xf32>
    %66 = arith.addf %65, %64 : vector<16x128xf32>
    %67 = arith.divf %65, %66 : vector<16x128xf32>
    %68 = vector.extract_strided_slice %67 {offsets = [0, 0], sizes = [16, 32], strides = [1, 1]} : vector<16x128xf32> to vector<16x32xf32>
    %69 = vector.extract_strided_slice %67 {offsets = [0, 32], sizes = [16, 32], strides = [1, 1]} : vector<16x128xf32> to vector<16x32xf32>
    %70 = vector.extract_strided_slice %67 {offsets = [0, 96], sizes = [16, 32], strides = [1, 1]} : vector<16x128xf32> to vector<16x32xf32>
    %71 = vector.extract_strided_slice %62 {offsets = [0, 64], sizes = [16, 32], strides = [1, 1]} : vector<16x128xf32> to vector<16x32xf32>
    %72 = math.tanh %71 : vector<16x32xf32>
    %73 = arith.mulf %69, %8 : vector<16x32xf32>
    %74 = arith.mulf %68, %72 : vector<16x32xf32>
    %75 = arith.addf %73, %74 : vector<16x32xf32>
    %76 = math.tanh %75 : vector<16x32xf32>
    %77 = arith.mulf %70, %76 : vector<16x32xf32>
    %c0_37 = arith.constant 0 : index
    %c64 = arith.constant 64 : index
    %78 = vector.load %arg12[%c0_37, %c64] : memref<16x136xf32, #tpu.memory_space<vmem>>, vector<16x32xf32>
    tpu.vector_store %arg12[%c0_37, %c64], %77 {strides = array<i32>} : memref<16x136xf32, #tpu.memory_space<vmem>>, vector<16x32xf32>,
    %c0_38 = arith.constant 0 : index
    %c96 = arith.constant 96 : index
    %79 = vector.load %arg12[%c0_38, %c96] : memref<16x136xf32, #tpu.memory_space<vmem>>, vector<16x32xf32>
    tpu.vector_store %arg12[%c0_38, %c96], %75 {strides = array<i32>} : memref<16x136xf32, #tpu.memory_space<vmem>>, vector<16x32xf32>,
    %c0_39 = arith.constant 0 : index
    %c0_40 = arith.constant 0 : index
    %80 = vector.load %arg8[%c0_39, %c0_40] : memref<64x64xf32, #tpu.memory_space<vmem>>, vector<64x64xf32>
    %81 = vector.extract_strided_slice %80 {offsets = [0, 0], sizes = [32, 64], strides = [1, 1]} : vector<64x64xf32> to vector<32x64xf32>
    %cst_41 = arith.constant dense<0.000000e+00> : vector<16x64xf32>
    %82 = tpu.matmul %77, %81, %cst_41 {dimension_numbers = #tpu.dot_dimension_numbers<[1], [0], [0], [1], [0, 0, 1, 1], [], []>} : vector<16x32xf32>, vector<32x64xf32>, vector<16x64xf32> -> vector<16x64xf32>
    %83 = vector.extract_strided_slice %80 {offsets = [32, 0], sizes = [32, 64], strides = [1, 1]} : vector<64x64xf32> to vector<32x64xf32>
    %cst_42 = arith.constant dense<0.000000e+00> : vector<16x64xf32>
    %84 = tpu.matmul %75, %83, %cst_42 {dimension_numbers = #tpu.dot_dimension_numbers<[1], [0], [0], [1], [0, 0, 1, 1], [], []>} : vector<16x32xf32>, vector<32x64xf32>, vector<16x64xf32> -> vector<16x64xf32>
    %85 = arith.addf %82, %84 : vector<16x64xf32>
    %c0_43 = arith.constant 0 : index
    %c0_44 = arith.constant 0 : index
    %86 = vector.load %arg9[%c0_43, %c0_44] : memref<1x64xf32, #tpu.memory_space<vmem>>, vector<1x64xf32>
    %87 = vector.broadcast %86 : vector<1x64xf32> to vector<16x64xf32>
    %88 = arith.addf %85, %87 : vector<16x64xf32>
    %cst_45 = arith.constant 0.000000e+00 : f32
    %89 = vector.broadcast %cst_45 : f32 to vector<16x64xf32>
    %90 = arith.maximumf %88, %89 : vector<16x64xf32>
    %c0_46 = arith.constant 0 : index
    %c0_47 = arith.constant 0 : index
    %91 = vector.load %arg10[%c0_46, %c0_47] : memref<64x8xf32, #tpu.memory_space<vmem>>, vector<64x8xf32>
    %cst_48 = arith.constant dense<0.000000e+00> : vector<16x8xf32>
    %92 = tpu.matmul %90, %91, %cst_48 {dimension_numbers = #tpu.dot_dimension_numbers<[1], [0], [0], [1], [0, 0, 1, 1], [], []>} : vector<16x64xf32>, vector<64x8xf32>, vector<16x8xf32> -> vector<16x8xf32>
    %c0_49 = arith.constant 0 : index
    %c0_50 = arith.constant 0 : index
    %93 = vector.load %arg11[%c0_49, %c0_50] : memref<1x8xf32, #tpu.memory_space<vmem>>, vector<1x8xf32>
    %94 = vector.broadcast %93 : vector<1x8xf32> to vector<16x8xf32>
    %95 = arith.addf %92, %94 : vector<16x8xf32>
    %cst_51 = arith.constant 0.000000e+00 : f32
    %96 = vector.broadcast %cst_51 : f32 to vector<16x8xf32>
    %97 = arith.maximumf %95, %96 : vector<16x8xf32>
    %c0_52 = arith.constant 0 : index
    %c128 = arith.constant 128 : index
    %98 = vector.load %arg12[%c0_52, %c128] : memref<16x136xf32, #tpu.memory_space<vmem>>, vector<16x8xf32>
    tpu.vector_store %arg12[%c0_52, %c128], %97 {strides = array<i32>} : memref<16x136xf32, #tpu.memory_space<vmem>>, vector<16x8xf32>,
    return
  }
  func.func @transform_0(%arg0: i32) -> (i32, i32) {
    %c0_i32 = arith.constant 0 : i32
    %c0_i32_0 = arith.constant 0 : i32
    return %arg0, %c0_i32 : i32, i32
  }
  func.func @transform_1(%arg0: i32) -> (i32, i32) {
    %c0_i32 = arith.constant 0 : i32
    %c0_i32_0 = arith.constant 0 : i32
    return %arg0, %c0_i32 : i32, i32
  }
  func.func @transform_2(%arg0: i32) -> (i32, i32) {
    %c0_i32 = arith.constant 0 : i32
    %c0_i32_0 = arith.constant 0 : i32
    %c0_i32_1 = arith.constant 0 : i32
    return %c0_i32, %c0_i32_0 : i32, i32
  }
  func.func @transform_3(%arg0: i32) -> (i32, i32) {
    %c0_i32 = arith.constant 0 : i32
    %c0_i32_0 = arith.constant 0 : i32
    %c0_i32_1 = arith.constant 0 : i32
    return %c0_i32, %c0_i32_0 : i32, i32
  }
  func.func @transform_4(%arg0: i32) -> (i32, i32, i32) {
    %c0_i32 = arith.constant 0 : i32
    %c0_i32_0 = arith.constant 0 : i32
    %c0_i32_1 = arith.constant 0 : i32
    %c0_i32_2 = arith.constant 0 : i32
    return %c0_i32, %c0_i32_0, %c0_i32_1 : i32, i32, i32
  }
  func.func @transform_5(%arg0: i32) -> (i32, i32, i32) {
    %c0_i32 = arith.constant 0 : i32
    %c0_i32_0 = arith.constant 0 : i32
    %c0_i32_1 = arith.constant 0 : i32
    %c0_i32_2 = arith.constant 0 : i32
    return %c0_i32, %c0_i32_0, %c0_i32_1 : i32, i32, i32
  }
  func.func @transform_6(%arg0: i32) -> (i32, i32, i32) {
    %c0_i32 = arith.constant 0 : i32
    %c0_i32_0 = arith.constant 0 : i32
    %c0_i32_1 = arith.constant 0 : i32
    %c0_i32_2 = arith.constant 0 : i32
    return %c0_i32, %c0_i32_0, %c0_i32_1 : i32, i32, i32
  }
  func.func @transform_7(%arg0: i32) -> (i32, i32) {
    %c0_i32 = arith.constant 0 : i32
    %c0_i32_0 = arith.constant 0 : i32
    %c0_i32_1 = arith.constant 0 : i32
    return %c0_i32, %c0_i32_0 : i32, i32
  }
  func.func @transform_8(%arg0: i32) -> (i32, i32) {
    %c0_i32 = arith.constant 0 : i32
    %c0_i32_0 = arith.constant 0 : i32
    %c0_i32_1 = arith.constant 0 : i32
    return %c0_i32, %c0_i32_0 : i32, i32
  }
  func.func @transform_9(%arg0: i32) -> (i32, i32) {
    %c0_i32 = arith.constant 0 : i32
    %c0_i32_0 = arith.constant 0 : i32
    %c0_i32_1 = arith.constant 0 : i32
    return %c0_i32, %c0_i32_0 : i32, i32
  }
  func.func @transform_10(%arg0: i32) -> (i32, i32) {
    %c0_i32 = arith.constant 0 : i32
    %c0_i32_0 = arith.constant 0 : i32
    %c0_i32_1 = arith.constant 0 : i32
    return %c0_i32, %c0_i32_0 : i32, i32
  }
  func.func @transform_11(%arg0: i32) -> (i32, i32) {
    %c0_i32 = arith.constant 0 : i32
    %c0_i32_0 = arith.constant 0 : i32
    return %arg0, %c0_i32 : i32, i32
  }
}

</mosaic_0001>

<bundles_post_ra>
// kernel: custom-call.1
= control target key start
LH: loop header
LB: loop body
LE: loop exit
PB: predicated region body
PF: predicated region fallthrough
CT: control target
= control target key end

     0   :  { %s6_s0 = inlined_call_operand.vmem [shape: u32[12], index: 0, kind: output, shape index: {}]  }

// kernel: _lstm_forward_impl.1
= control target key start
LH: loop header
LB: loop body
LE: loop exit
PB: predicated region body
PF: predicated region fallthrough
CT: control target
= control target key end

     0   :  { %v80_v0 = vlaneseq  ;;  %vm48_vm0 = vcmask 130048   ;;  %vm134_vm2 = vcmask 261120   ;;  %s663_s30 = smov 32   ;;  %s664_s13 = smov 64   ;;  %vm289_vm11 = vcmask 523520   ;;  %s948_s2 = inlined_call_operand.vmem [shape: f32[16,32], index: 2, kind: input, shape index: {}]   ;;  %s949_s0 = inlined_call_operand.vmem [shape: f32[16,16], index: 0, kind: input, shape index: {}]   ;;  %s950_s5 = inlined_call_operand.vmem [shape: f32[2,32,128], index: 5, kind: input, shape index: {}]   ;;  %s951_s3 = inlined_call_operand.vmem [shape: f32[1,32], index: 3, kind: input, shape index: {}]   ;;  %s952_s1 = inlined_call_operand.vmem [shape: f32[16,16], index: 1, kind: input, shape index: {}]   ;;  %s953_s4 = inlined_call_operand.vmem [shape: f32[2,32,128], index: 4, kind: input, shape index: {}]   ;;  %s954_s6 = inlined_call_operand.vmem [shape: f32[2,1,128], index: 6, kind: input, shape index: {}]   ;;  %s955_s11 = inlined_call_operand.vmem [shape: f32[16,136], index: 11, kind: output, shape index: {}]   ;;  %s956_s7 = inlined_call_operand.vmem [shape: f32[64,64], index: 7, kind: input, shape index: {}]   ;;  %s957_s8 = inlined_call_operand.vmem [shape: f32[1,64], index: 8, kind: input, shape index: {}]   ;;  %s958_s9 = inlined_call_operand.vmem [shape: f32[64,8], index: 9, kind: input, shape index: {}]   ;;  %s959_s10 = inlined_call_operand.vmem [shape: f32[1,8], index: 10, kind: input, shape index: {}]  }
   0x1   :  { %v43_v1 = vld [vmem:[%s948_s2 + $0x8] sm:$0xff]  ;;  %v42_v2 = vld [vmem:[%s948_s2] sm:$0xff]  ;;  %v133_v6 = vld [vmem:[%s950_s5 + $0x18] sm:$0xff]  ;;  %s665_s14 = smov 16  }
   0x2   :  { %69 = vmatpush.msra.mxu0 %v43_v1  ;;  %620 = vmatpush.msra.mxu1 %v43_v1  ;;  %v38_v3 = vld [vmem:[%s949_s0] sm:$0xff]  ;;  %v39_v4 = vld [vmem:[%s949_s0 + $0x8] sm:$0xff]  ;;  %v739_v5 = vand.u32 127, %v80_v0  ;;  %v606_v7 = vld [vmem:[%s950_s5 + $0x38] sm:$0xff] }
   0x3   :  { %153 = vmatpush.msra.mxu2 %v133_v6  ;;  %v752_v8 = vld [vmem:[%s952_s1] sm:$0xff]  ;;  %v760_v10 = vld [vmem:[%s952_s1 + $0x8] sm:$0xff]  ;;  %v132_v12 = vld [vmem:[%s950_s5 + $0x10] sm:$0xff] }
   0x4   :  { %70 = vmatpush.msra.mxu0 %v42_v2  ;;  %621 = vmatpush.msra.mxu1 %v42_v2  ;;  %vm82_vm1 = vcmp.ge.s32.totalorder %v739_v5, 6  ;;  %v605_v13 = vld [vmem:[%s950_s5 + $0x30] sm:$0xff]  ;;  %v131_v14 = vld [vmem:[%s950_s5 + $0x8] sm:$0xff]  ;;  %v130_v16 = vld [vmem:[%s950_s5] sm:$0xff]  ;;  %vm292_vm12 = vcmp.ge.s32.totalorder %v739_v5, 22 }
   0x5   :  { %589 = vmatmul.msk.f32.vlgmr.msra.gmra.mxu0 %vm48_vm0, %v38_v3  ;;  %590 = vmatmul.msk.f32.vlgmr.msra.gmra.mxu1 %vm48_vm0, %v39_v4  ;;  %v83_v9 = vsel %vm82_vm1, %v752_v8, %v38_v3  ;;  %v84_v11 = vsel %vm82_vm1, %v760_v10, %v39_v4  ;;  %v604_v15 = vld [vmem:[%s950_s5 + $0x28] sm:$0xff]  ;;  %v603_v17 = vld [vmem:[%s950_s5 + $0x20] sm:$0xff]  ;;  %v129_v18 = vld [vmem:[%s953_s4 + $0x18] sm:$0xff] }
   0x6   :  { %105 = vmatpush.msrb.mxu1 %v43_v1  ;;  %317 = vmatpush.msrb.mxu0 %v606_v7  ;;  %v128_v19 = vld [vmem:[%s953_s4 + $0x10] sm:$0xff]  ;;  %v127_v20 = vld [vmem:[%s953_s4 + $0x8] sm:$0xff]  ;;  %v126_v21 = vld [vmem:[%s953_s4] sm:$0xff] }
   0x7   :  { %154 = vmatpush.msra.mxu2 %v132_v12  ;;  %182 = vmatpush.msra.mxu3 %v129_v18  ;;  %v626_v22 = vld [vmem:[%s951_s3] ss:$0 sm:$0xff] }
   0x8   :  { %106 = vmatpush.msrb.mxu1 %v42_v2  ;;  %318 = vmatpush.msrb.mxu0 %v605_v13  ;;  %v627_v36 = vld [vmem:[%s954_s6] ss:$0 sm:$0xff] }
   0x9   :  { %155 = vmatpush.msra.mxu2 %v131_v14  ;;  %183 = vmatpush.msra.mxu3 %v128_v19 }
   0xa   :  { %319 = vmatpush.msrb.mxu0 %v604_v15 }
   0xb   :  { %156 = vmatpush.msra.mxu2 %v130_v16  ;;  %184 = vmatpush.msra.mxu3 %v127_v20 }
   0xc   :  { %320 = vmatpush.msrb.mxu0 %v603_v17 }
   0xd   :  { %591 = vmatmul.msk.f32.vlgmr.msrb.gmra.mxu1 %vm48_vm0, %v83_v9  ;;  %185 = vmatpush.msra.mxu3 %v126_v21 }
  0x15   :  { %592 = vmatmul.msk.f32.gmra.mxu1 %vm48_vm0, %v84_v11 }
  0x82   :  { %v72_v23 = vpop.f32.mrf.mxu0  ;;  %v75_v24 = vpop.f32.mrf.mxu1 }
  0x83   :  { %v73_v25 = vadd.f32 %v626_v22, %v72_v23  ;;  %v76_v26 = vadd.f32 %v626_v22, %v75_v24 }
  0x85   :  { %v78_v27 = vmax.f32 %v73_v25, 0.0  ;;  %v79_v28 = vmax.f32 %v76_v26, 0.0 }
  0x87   :  { %241 = vrot.lane.b32.xlu2 %v79_v28, %s663_s30  ;;  %593 = vmatmul.msk.f32.vlgmr.msra.gmra.mxu2 %vm134_vm2, %v78_v27 }
  0x88   :  { %607 = vmatmul.msk.f32.vlgmr.msrb.gmra.mxu0 %vm134_vm2, %v78_v27  ;;  %239 = vrot.lane.b32.xlu1 %v78_v27, %s663_s30 }
  0x8a   :  { %v108_v29 = vpop.f32.mrf.mxu1 }
  0x8b   :  { %v109_v30 = vadd.f32 %v626_v22, %v108_v29  ;;  %v600_v29 = vld [vmem:[%s953_s4 + $0x28] sm:$0xff] }
  0x8d   :  { %v114_v31 = vmax.f32 %v109_v30, 0.0  ;;  %v599_v30 = vld [vmem:[%s953_s4 + $0x20] sm:$0xff] }
  0x8f   :  { %595 = vmatmul.msk.f32.vlgmr.msra.gmra.mxu3 %vm134_vm2, %v114_v31  ;;  %594 = vmatmul.msk.f32.gmra.mxu2 %vm134_vm2, %v79_v28 }
  0x90   :  { %608 = vmatmul.msk.f32.gmra.mxu0 %vm134_vm2, %v79_v28  ;;  %v602_v28 = vld [vmem:[%s953_s4 + $0x38] sm:$0xff] }
  0x91   :  { %346 = vmatpush.msra.mxu1 %v602_v28 }
  0x92   :  { %v111_v32 = vpop.f32.mrf.mxu1 }
  0x93   :  { %v112_v33 = vadd.f32 %v626_v22, %v111_v32 }
  0x95   :  { %v115_v34 = vmax.f32 %v112_v33, 0.0 }
  0x97   :  { %596 = vmatmul.msk.f32.gmra.mxu3 %vm134_vm2, %v115_v34 }
  0xe1   :  { %v813_v15 = vpop.permute.xlu2 %241 }
  0xfa   :  { %v816_v19 = vpop.permute.xlu1 %239 }
 0x105   :  { %v322_v5 = vpop.f32.mrf.mxu0 }
 0x10a   :  { %v158_v35 = vpop.f32.mrf.mxu2 }
 0x112   :  { %v187_v37 = vpop.f32.mrf.mxu3  ;;  %v161_v40 = vpop.f32.mrf.mxu2 }
 0x113   :  { %v188_v38 = vadd.f32 %v187_v37, %v158_v35 }
 0x115   :  { %v197_v39 = vadd.f32 %v627_v36, %v188_v38 }
 0x117   :  { %631 = vtanh.f32 %v197_v39  ;;  %v597_v46 = vmul.f32 -1.442695, %v197_v39  ;;  %v628_v39 = vld [vmem:[%s954_s6 + $0x1] ss:$0 sm:$0xff]  ;;  %s666_s6 = smov 96  }
 0x11a   :  { %v190_v41 = vpop.f32.mrf.mxu3 }
 0x11b   :  { %v191_v42 = vadd.f32 %v190_v41, %v161_v40 }
 0x11d   :  { %v632_v43 = vpop.eup %631  ;;  %v198_v44 = vadd.f32 %v627_v36, %v191_v42 }
 0x11e   :  { %249 = vrot.lane.b32.xlu0 %v632_v43, %s664_s13  ;;  %v325_v43 = vpop.f32.mrf.mxu0 }
 0x11f   :  { %633 = vtanh.f32 %v198_v44  ;;  %v598_v47 = vmul.f32 -1.442695, %v198_v44 }
 0x120   :  { %635 = vpow2.f32 %v597_v46 }
 0x121   :  { %637 = vpow2.f32 %v598_v47 }
 0x125   :  { %v634_v45 = vpop.eup %633 }
 0x126   :  { %251 = vrot.lane.b32.xlu0 %v634_v45, %s664_s13  ;;  %v636_v48 = vpop.eup %635 }
 0x127   :  { %v205_v49 = vadd.f32 1.0, %v636_v48  ;;  %v638_v50 = vpop.eup %637 }
 0x128   :  { %v206_v51 = vadd.f32 1.0, %v638_v50 }
 0x129   :  { %639 = vrcp.f32 %v205_v49  ;;  %v218_v60 = vand.u32 2147483648, %v205_v49  ;;  %vm212_vm4 = vweird.f32 %v205_v49  ;;  %v216_v61 = vand.u32 2147483647, %v205_v49 }
 0x12a   :  { %641 = vrcp.f32 %v206_v51  ;;  %v233_v6 = vand.u32 2147483648, %v206_v51  ;;  %vm227_vm8 = vweird.f32 %v206_v51  ;;  %v231_v7 = vand.u32 2147483647, %v206_v51 }
 0x12b   :  { %v219_v0 = vor.u32 1.1754944e-38, %v218_v60  ;;  %vm217_vm6 = vcmp.eq.f32.partialorder %v216_v61, 8.507059e+37 }
 0x12c   :  { %v234_v11 = vor.u32 1.1754944e-38, %v233_v6  ;;  %vm232_vm10 = vcmp.eq.f32.partialorder %v231_v7, 8.507059e+37 }
 0x12f   :  { %v640_v52 = vpop.eup %639 }
 0x130   :  { %v208_v53 = vmul.f32 %v640_v52, %v205_v49  ;;  %v642_v55 = vpop.eup %641  ;;  %vm213_vm3 = vweird.f32 %v640_v52 }
 0x131   :  { %v223_v57 = vmul.f32 %v642_v55, %v206_v51  ;;  %vm214_vm5 = vmor %vm212_vm4, %vm213_vm3  ;;  %vm228_vm7 = vweird.f32 %v642_v55 }
 0x132   :  { %v209_v54 = vsub.f32 1.0, %v208_v53  ;;  %vm229_vm9 = vmor %vm227_vm8, %vm228_vm7  ;;  %vm457_vm7 = vcmask 1048320   ;;  %vm582_vm8 = vcmask 64512  }
 0x133   :  { %v224_v59 = vsub.f32 1.0, %v223_v57 }
 0x134   :  { %v210_v56 = vmul.f32 %v640_v52, %v209_v54 }
 0x135   :  { %v225_v63 = vmul.f32 %v642_v55, %v224_v59 }
 0x136   :  { %v211_v58 = vadd.f32 %v640_v52, %v210_v56 }
 0x137   :  { %v226_v4 = vadd.f32 %v642_v55, %v225_v63 }
 0x138   :  { %v215_v62 = vsel %vm214_vm5, %v640_v52, %v211_v58 }
 0x139   :  { %v220_v2 = vsel %vm217_vm6, %v219_v0, %v215_v62  ;;  %v230_v9 = vsel %vm229_vm9, %v642_v55, %v226_v4  ;;  %vm446_vm6 = vcmask 785920  }
 0x13a   :  { %v235_v13 = vsel %vm232_vm10, %v234_v11, %v230_v9  ;;  %v245_v21 = vmul.f32 %v816_v19, %v220_v2 }
 0x13b   :  { %v246_v16 = vmul.f32 %v813_v15, %v235_v13 }
 0x190   :  { %v250_v1 = vpop.permute.xlu0 %249 }
 0x191   :  { %v255_v3 = vmul.f32 %v250_v1, %v220_v2 }
 0x193   :  { %259 = vrot.lane.b32.xlu1 %v255_v3, %s663_s30 }
 0x198   :  { %v252_v12 = vpop.permute.xlu0 %251 }
 0x199   :  { %v256_v14 = vmul.f32 %v252_v12, %v235_v13 }
 0x19b   :  { %261 = vrot.lane.b32.xlu2 %v256_v14, %s663_s30 }
 0x1a3   :  { %118 = vrot.lane.b32.xlu2 %v752_v8, %s665_s14 }
 0x1f5   :  { %v262_v17 = vpop.permute.xlu2 %261 }
 0x1f6   :  { %v266_v18 = vadd.f32 %v262_v17, %v246_v16 }
 0x1f8   :  { %643 = vtanh.f32 %v266_v18 }
 0x1fd   :  { %v119_v31 = vpop.permute.xlu2 %118 }
 0x1fe   :  { %v644_v20 = vpop.eup %643  ;;  %v124_v33 = vsel %vm48_vm0, 0.0, %v119_v31 }
 0x1ff   :  { %273 = vrot.lane.b32.xlu1 %v644_v20, %s664_s13 }
 0x205   :  { %v260_v22 = vpop.permute.xlu1 %259 }
 0x206   :  { %v265_v23 = vadd.f32 %v260_v22, %v245_v21 }
 0x207   :  { %120 = vrot.lane.b32.xlu1 %v760_v10, %s665_s14  ;;  %v601_v10 = vld [vmem:[%s953_s4 + $0x30] sm:$0xff] }
 0x208   :  { %645 = vtanh.f32 %v265_v23  ;;  %347 = vmatpush.msra.mxu1 %v601_v10 }
 0x20a   :  { %348 = vmatpush.msra.mxu1 %v600_v29 }
 0x20c   :  { %349 = vmatpush.msra.mxu1 %v599_v30 }
 0x20e   :  { %v646_v8 = vpop.eup %645 }
 0x20f   :  { %271 = vrot.lane.b32.xlu0 %v646_v8, %s664_s13  ;;  %v467_v8 = vld [vmem:[%s956_s7 + $0x38] sm:$0xff] }
 0x210   :  { %488 = vmatpush.msrb.mxu2 %v467_v8 }
 0x271   :  { %v274_v24 = vpop.permute.xlu1 %273 }
 0x272   :  { %v278_v25 = vmul.f32 %v274_v24, %v235_v13  ;;  %v466_v24 = vld [vmem:[%s956_s7 + $0x30] sm:$0xff] }
 0x273   :  { %489 = vmatpush.msrb.mxu2 %v466_v24 }
 0x274   :  { %283 = vrot.lane.b32.xlu2 %v278_v25, %s663_s30  ;;  %v464_v25 = vld [vmem:[%s956_s7 + $0x20] sm:$0xff] }
 0x279   :  { %v121_v36 = vpop.permute.xlu1 %120 }
 0x27a   :  { %v125_v37 = vsel %vm48_vm0, 0.0, %v121_v36  ;;  %v461_v36 = vld [vmem:[%s956_s7 + $0x8] sm:$0xff] }
 0x281   :  { %v272_v26 = vpop.permute.xlu0 %271 }
 0x282   :  { %v277_v27 = vmul.f32 %v272_v26, %v220_v2 }
 0x284   :  { %281 = vrot.lane.b32.xlu0 %v277_v27, %s663_s30 }
 0x2ce   :  { %v284_v32 = vpop.permute.xlu2 %283 }
 0x2cf   :  { %288 = vst.msk [vmem:[%s955_s11 + $0x10] sm:$0xff] %vm134_vm2, %v284_v32  ;;  %v294_v38 = vsel %vm292_vm12, %v125_v37, %v284_v32  ;;  %v460_v37 = vld [vmem:[%s956_s7] sm:$0xff] }
 0x2d0   :  { %291 = vst.msk [vmem:[%s955_s11 + $0x10] sm:$0xff] %vm289_vm11, %v266_v18 }
 0x2f6   :  { %v282_v34 = vpop.permute.xlu0 %281 }
 0x2f7   :  { %287 = vst.msk [vmem:[%s955_s11] sm:$0xff] %vm134_vm2, %v282_v34  ;;  %v293_v35 = vsel %vm292_vm12, %v124_v33, %v282_v34  ;;  %v463_v34 = vld [vmem:[%s956_s7 + $0x18] sm:$0xff] }
 0x2f8   :  { %290 = vst.msk [vmem:[%s955_s11] sm:$0xff] %vm289_vm11, %v265_v23  ;;  %609 = vmatmul.msk.f32.vlgmr.msra.gmra.mxu1 %vm134_vm2, %v293_v35  ;;  %v462_v35 = vld [vmem:[%s956_s7 + $0x10] sm:$0xff]  ;;  %519 = vmatpush.msrb.mxu3 %v463_v34 }
 0x2fa   :  { %520 = vmatpush.msrb.mxu3 %v462_v35 }
 0x2fc   :  { %521 = vmatpush.msrb.mxu3 %v461_v36 }
 0x2fe   :  { %522 = vmatpush.msrb.mxu3 %v460_v37 }
 0x300   :  { %610 = vmatmul.msk.f32.gmra.mxu1 %vm134_vm2, %v294_v38 }
 0x375   :  { %v351_v40 = vpop.f32.mrf.mxu1 }
 0x376   :  { %v352_v41 = vadd.f32 %v351_v40, %v322_v5  ;;  %v545_v5 = vld [vmem:[%s958_s9 + $0x38] sm:$0xff] }
 0x377   :  { %565 = vmatpush.msra.mxu0 %v545_v5 }
 0x378   :  { %v362_v42 = vadd.f32 %v628_v39, %v352_v41  ;;  %v543_v41 = vld [vmem:[%s958_s9 + $0x28] sm:$0xff] }
 0x37a   :  { %647 = vtanh.f32 %v362_v42  ;;  %v612_v49 = vmul.f32 -1.442695, %v362_v42  ;;  %v542_v42 = vld [vmem:[%s958_s9 + $0x20] sm:$0xff] }
 0x37d   :  { %v354_v44 = vpop.f32.mrf.mxu1 }
 0x37e   :  { %v355_v45 = vadd.f32 %v354_v44, %v325_v43  ;;  %v541_v43 = vld [vmem:[%s958_s9 + $0x18] sm:$0xff] }
 0x380   :  { %v648_v46 = vpop.eup %647  ;;  %v363_v47 = vadd.f32 %v628_v39, %v355_v45  ;;  %v544_v39 = vld [vmem:[%s958_s9 + $0x30] sm:$0xff] }
 0x381   :  { %408 = vrot.lane.b32.xlu0 %v648_v46, %s664_s13  ;;  %566 = vmatpush.msra.mxu0 %v544_v39 }
 0x382   :  { %649 = vtanh.f32 %v363_v47  ;;  %v613_v50 = vmul.f32 -1.442695, %v363_v47 }
 0x383   :  { %651 = vpow2.f32 %v612_v49  ;;  %567 = vmatpush.msra.mxu0 %v543_v41  ;;  %v539_v49 = vld [vmem:[%s958_s9 + $0x8] sm:$0xff] }
 0x384   :  { %653 = vpow2.f32 %v613_v50  ;;  %v538_v50 = vld [vmem:[%s958_s9] sm:$0xff] }
 0x385   :  { %568 = vmatpush.msra.mxu0 %v542_v42 }
 0x387   :  { %569 = vmatpush.msra.mxu0 %v541_v43 }
 0x388   :  { %v650_v48 = vpop.eup %649 }
 0x389   :  { %410 = vrot.lane.b32.xlu1 %v650_v48, %s664_s13  ;;  %v652_v51 = vpop.eup %651  ;;  %v540_v48 = vld [vmem:[%s958_s9 + $0x10] sm:$0xff] }
 0x38a   :  { %v370_v52 = vadd.f32 1.0, %v652_v51  ;;  %v654_v53 = vpop.eup %653  ;;  %570 = vmatpush.msra.mxu0 %v540_v48  ;;  %v629_v51 = vld [vmem:[%s957_s8] ss:$0 sm:$0xff] }
 0x38b   :  { %v371_v54 = vadd.f32 1.0, %v654_v53 }
 0x38c   :  { %655 = vrcp.f32 %v370_v52  ;;  %v383_v63 = vand.u32 2147483648, %v370_v52  ;;  %vm377_vm14 = vweird.f32 %v370_v52  ;;  %v381_v0 = vand.u32 2147483647, %v370_v52  ;;  %571 = vmatpush.msra.mxu0 %v539_v49 }
 0x38d   :  { %657 = vrcp.f32 %v371_v54  ;;  %v398_v11 = vand.u32 2147483648, %v371_v54  ;;  %vm392_vm3 = vweird.f32 %v371_v54  ;;  %v396_v12 = vand.u32 2147483647, %v371_v54 }
 0x38e   :  { %v384_v3 = vor.u32 1.1754944e-38, %v383_v63  ;;  %vm382_vm0 = vcmp.eq.f32.partialorder %v381_v0, 8.507059e+37  ;;  %572 = vmatpush.msra.mxu0 %v538_v50 }
 0x38f   :  { %v399_v14 = vor.u32 1.1754944e-38, %v398_v11  ;;  %vm397_vm5 = vcmp.eq.f32.partialorder %v396_v12, 8.507059e+37 }
 0x392   :  { %v656_v55 = vpop.eup %655 }
 0x393   :  { %v373_v56 = vmul.f32 %v656_v55, %v370_v52  ;;  %v658_v58 = vpop.eup %657  ;;  %vm378_vm13 = vweird.f32 %v656_v55 }
 0x394   :  { %v388_v60 = vmul.f32 %v658_v58, %v371_v54  ;;  %vm379_vm15 = vmor %vm377_vm14, %vm378_vm13  ;;  %vm393_vm1 = vweird.f32 %v658_v58 }
 0x395   :  { %v374_v57 = vsub.f32 1.0, %v373_v56  ;;  %vm394_vm4 = vmor %vm392_vm3, %vm393_vm1 }
 0x396   :  { %v389_v62 = vsub.f32 1.0, %v388_v60 }
 0x397   :  { %v375_v59 = vmul.f32 %v656_v55, %v374_v57 }
 0x398   :  { %v390_v2 = vmul.f32 %v658_v58, %v389_v62  ;;  %v630_v62 = vld [vmem:[%s959_s10] ss:$0 sm:$0xff] }
 0x399   :  { %v376_v61 = vadd.f32 %v656_v55, %v375_v59 }
 0x39a   :  { %v391_v9 = vadd.f32 %v658_v58, %v390_v2 }
 0x39b   :  { %v380_v1 = vsel %vm379_vm15, %v656_v55, %v376_v61 }
 0x39c   :  { %v385_v6 = vsel %vm382_vm0, %v384_v3, %v380_v1  ;;  %v395_v13 = vsel %vm394_vm4, %v658_v58, %v391_v9 }
 0x39d   :  { %v400_v17 = vsel %vm397_vm5, %v399_v14, %v395_v13  ;;  %v404_v20 = vmul.f32 %v385_v6, %v816_v19  ;;  %v465_v19 = vld [vmem:[%s956_s7 + $0x28] sm:$0xff] }
 0x39e   :  { %490 = vmatpush.msrb.mxu2 %v465_v19  ;;  %v405_v26 = vmul.f32 %v400_v17, %v813_v15 }
 0x3a0   :  { %491 = vmatpush.msrb.mxu2 %v464_v25 }
 0x3f3   :  { %v409_v4 = vpop.permute.xlu0 %408 }
 0x3f4   :  { %v414_v7 = vmul.f32 %v409_v4, %v385_v6 }
 0x3f6   :  { %418 = vrot.lane.b32.xlu2 %v414_v7, %s663_s30 }
 0x3fb   :  { %v411_v16 = vpop.permute.xlu1 %410 }
 0x3fc   :  { %v415_v18 = vmul.f32 %v411_v16, %v400_v17 }
 0x3fe   :  { %420 = vrot.lane.b32.xlu0 %v415_v18, %s663_s30 }
 0x450   :  { %v419_v21 = vpop.permute.xlu2 %418 }
 0x451   :  { %v424_v22 = vadd.f32 %v419_v21, %v404_v20 }
 0x453   :  { %659 = vtanh.f32 %v424_v22  ;;  %468 = vrot.lane.b32.xlu0 %v424_v22, %s666_s6 }
 0x459   :  { %v660_v23 = vpop.eup %659 }
 0x45a   :  { %430 = vrot.lane.b32.xlu1 %v660_v23, %s664_s13 }
 0x470   :  { %v421_v27 = vpop.permute.xlu0 %420 }
 0x471   :  { %v425_v28 = vadd.f32 %v421_v27, %v405_v26 }
 0x473   :  { %661 = vtanh.f32 %v425_v28 }
 0x479   :  { %v662_v10 = vpop.eup %661 }
 0x47a   :  { %432 = vrot.lane.b32.xlu2 %v662_v10, %s664_s13 }
 0x482   :  { %470 = vrot.lane.b32.xlu2 %v425_v28, %s666_s6 }
 0x4c5   :  { %v469_v29 = vpop.permute.xlu0 %468 }
 0x4c6   :  { %614 = vmatmul.msk.f32.vlgmr.msrb.gmra.mxu2 %vm134_vm2, %v469_v29 }
 0x4cc   :  { %v431_v30 = vpop.permute.xlu1 %430 }
 0x4cd   :  { %v436_v31 = vmul.f32 %v431_v30, %v385_v6 }
 0x4cf   :  { %499 = vrot.lane.b32.xlu1 %v436_v31, %s663_s30 }
 0x4d4   :  { %v433_v32 = vpop.permute.xlu2 %432 }
 0x4d5   :  { %v437_v33 = vmul.f32 %v433_v32, %v400_v17 }
 0x4d7   :  { %440 = vrot.lane.b32.xlu1 %v436_v31, %s666_s6  ;;  %442 = vrot.lane.b32.xlu2 %v437_v33, %s666_s6 }
 0x4d8   :  { %501 = vrot.lane.b32.xlu0 %v437_v33, %s663_s30 }
 0x4dc   :  { %v471_v15 = vpop.permute.xlu2 %470 }
 0x4dd   :  { %615 = vmatmul.msk.f32.gmra.mxu2 %vm134_vm2, %v471_v15 }
 0x4df   :  { %453 = vrot.lane.b32.xlu1 %v425_v28, %s664_s13 }
 0x4e0   :  { %451 = vrot.lane.b32.xlu0 %v424_v22, %s664_s13 }
 0x531   :  { %v443_v38 = vpop.permute.xlu2 %442 }
 0x532   :  { %448 = vst.msk [vmem:[%s955_s11 + $0x10] sm:$0xff] %vm446_vm6, %v443_v38 }
 0x541   :  { %v500_v40 = vpop.permute.xlu1 %499 }
 0x542   :  { %616 = vmatmul.msk.f32.vlgmr.msrb.gmra.mxu3 %vm134_vm2, %v500_v40 }
 0x549   :  { %v441_v44 = vpop.permute.xlu1 %440  ;;  %v493_v52 = vpop.f32.mrf.mxu2 }
 0x54a   :  { %447 = vst.msk [vmem:[%s955_s11] sm:$0xff] %vm446_vm6, %v441_v44  ;;  %v502_v45 = vpop.permute.xlu0 %501 }
 0x54b   :  { %617 = vmatmul.msk.f32.gmra.mxu3 %vm134_vm2, %v502_v45  ;;  %vm550_vm2 = vcmask 523264  }
 0x551   :  { %v454_v46 = vpop.permute.xlu1 %453 }
 0x552   :  { %459 = vst.msk [vmem:[%s955_s11 + $0x10] sm:$0xff] %vm457_vm7, %v454_v46  ;;  %v452_v47 = vpop.permute.xlu0 %451 }
 0x553   :  { %458 = vst.msk [vmem:[%s955_s11] sm:$0xff] %vm457_vm7, %v452_v47 }
 0x560   :  { %v496_v57 = vpop.f32.mrf.mxu2 }
 0x5c5   :  { %v524_v53 = vpop.f32.mrf.mxu3 }
 0x5c6   :  { %v525_v54 = vadd.f32 %v524_v53, %v493_v52 }
 0x5c8   :  { %v534_v55 = vadd.f32 %v629_v51, %v525_v54 }
 0x5ca   :  { %v536_v56 = vmax.f32 %v534_v55, 0.0 }
 0x5cc   :  { %618 = vmatmul.msk.f32.vlgmr.msra.gmra.mxu0 %vm550_vm2, %v536_v56 }
 0x5ce   :  { %v527_v58 = vpop.f32.mrf.mxu3 }
 0x5cf   :  { %v528_v59 = vadd.f32 %v527_v58, %v496_v57 }
 0x5d1   :  { %v535_v60 = vadd.f32 %v629_v51, %v528_v59 }
 0x5d3   :  { %v537_v61 = vmax.f32 %v535_v60, 0.0 }
 0x5d5   :  { %619 = vmatmul.msk.f32.gmra.mxu0 %vm550_vm2, %v537_v61 }
 0x649   :  { %v574_v63 = vpop.f32.mrf.mxu0 }
 0x64a   :  { %v575_v0 = vadd.f32 %v630_v62, %v574_v63 }
 0x64c   :  { %v580_v1 = vmax.f32 %v575_v0, 0.0 }
 0x64e   :  { %583 = vst.msk [vmem:[%s955_s11 + $0x8] sm:$0xff] %vm582_vm8, %v580_v1 }
 0x652   :  { %v577_v2 = vpop.f32.mrf.mxu0 }
 0x653   :  { %v578_v3 = vadd.f32 %v630_v62, %v577_v2 }
 0x655   :  { %v581_v4 = vmax.f32 %v578_v3, 0.0 }
 0x657   :  { %584 = vst.msk [vmem:[%s955_s11 + $0x18] sm:$0xff] %vm582_vm8, %v581_v4 }

</bundles_post_ra>
